<compile_context>
chip_gen: v7x
topology: tpu7x:2x2x1
jax: 0.10.0
libtpu: 0.0.40
codegen_flags: <defaults>
</compile_context>

<pallas_src>
import jax
import jax.numpy as jnp
from jax.experimental import pallas as pl
from jax.experimental.pallas import tpu as pltpu


def _conv2x2_mm_kernel(w_ref, p_ref, o_ref):
    # One MXU matmul per M-tile: (Cout, K) @ (K, TM) -> (Cout, TM), f32 accumulate.
    o_ref[...] = jnp.dot(
        w_ref[...], p_ref[...], preferred_element_type=jnp.float32
    ).astype(o_ref.dtype)


def _round_up(v, m):
    return ((v + m - 1) // m) * m


def conv2x2(x, w, *, stride=1, padding=1, block_m=512):
    """Forward pass of Conv2x2: 2x2 conv, dilation=2, no bias. NCHW in / NCHW out.

    x: (N, Cin, H, W), w: (Cout, Cin, 2, 2)  (PyTorch OIHW layout).
    block_m: M-tile width in output pixels (rounded to a multiple of 128).
    """
    N, Cin, H, W = x.shape
    Cout, Cin_w, KH, KW = w.shape
    assert (KH, KW) == (2, 2) and Cin_w == Cin
    dil = 2
    Hout = (H + 2 * padding - dil * (KH - 1) - 1) // stride + 1
    Wout = (W + 2 * padding - dil * (KW - 1) - 1) // stride + 1

    # ---- im2col (layout plumbing, stays in XLA) -------------------------------
    # Zero-pad spatially, then gather the 4 dilated taps.  K-axis ordering is
    # (cin, kh, kw) to match w.reshape(Cout, Cin*KH*KW).
    xp = jnp.pad(x, ((0, 0), (0, 0), (padding, padding), (padding, padding)))
    taps = []
    for kh in range(KH):
        for kw in range(KW):
            r0, c0 = kh * dil, kw * dil
            t = xp[:, :,
                   r0:r0 + (Hout - 1) * stride + 1:stride,
                   c0:c0 + (Wout - 1) * stride + 1:stride]  # (N, Cin, Hout, Wout)
            taps.append(t)
    patches = jnp.stack(taps, axis=2)                            # (N, Cin, 4, Hout, Wout)
    Kdim = Cin * KH * KW
    M = N * Hout * Wout
    patches = patches.transpose(1, 2, 0, 3, 4).reshape(Kdim, M)  # (K, M)
    w2 = w.reshape(Cout, Kdim)                                   # (Cout, K)

    # ---- pad to unmasked tile shapes -------------------------------------------
    # M (lane axis): pad to a multiple of TM (itself a multiple of 128) so every
    # store is a full-lane, unmasked vst.
    TM = max(128, (block_m // 128) * 128)
    M_pad = _round_up(M, 128)
    TM = min(TM, M_pad)                      # don't over-tile tiny inputs
    M_pad = _round_up(M_pad, TM)
    # K and Cout (sublane axes): pad to multiples of 8 (zero padding, no effect
    # on the matmul result).
    K_pad = _round_up(Kdim, 8)
    Cout_pad = _round_up(Cout, 8)

    if (M_pad != M) or (K_pad != Kdim):
        patches = jnp.pad(patches, ((0, K_pad - Kdim), (0, M_pad - M)))
    if (K_pad != Kdim) or (Cout_pad != Cout):
        w2 = jnp.pad(w2, ((0, Cout_pad - Cout), (0, K_pad - Kdim)))

    grid = (M_pad // TM,)
    itemsize = jnp.dtype(x.dtype).itemsize
    cost = pl.CostEstimate(
        flops=2 * M_pad * K_pad * Cout_pad,
        transcendentals=0,
        bytes_accessed=(K_pad * M_pad + Cout_pad * K_pad + Cout_pad * M_pad) * itemsize,
    )

    out_cm = pl.pallas_call(
        _conv2x2_mm_kernel,
        out_shape=jax.ShapeDtypeStruct((Cout_pad, M_pad), x.dtype),
        grid_spec=pl.GridSpec(
            grid=grid,
            in_specs=[
                # Weights: small, same block index for every grid step
                # (fetched once, stays resident in VMEM).
                pl.BlockSpec((Cout_pad, K_pad), lambda i: (0, 0)),
                # Patch tile: full K, TM lanes of output pixels.
                pl.BlockSpec((K_pad, TM), lambda i: (0, i)),
            ],
            out_specs=pl.BlockSpec((Cout_pad, TM), lambda i: (0, i)),
        ),
        compiler_params=pltpu.CompilerParams(
            # "parallel": shards the M-grid across the 2 TensorCores on v7x;
            # neutral on v5e/v6e (single TC).
            dimension_semantics=("parallel",),
            vmem_limit_bytes=32 * 1024 * 1024,
        ),
        cost_estimate=cost,
    )(w2, patches)

    # Drop Cout / M padding and restore PyTorch NCHW layout.
    out = out_cm[:Cout, :M].reshape(Cout, N, Hout, Wout).transpose(1, 0, 2, 3)
    return out
    # Note: module default is bias=False, so no bias path is needed.


if __name__ == "__main__":
    key = jax.random.PRNGKey(0)
    kx, kw = jax.random.split(key)
    N, Cin, H, W = 2, 4, 16, 16
    Cout = 8
    x = jax.random.normal(kx, (N, Cin, H, W), dtype=jnp.float32)
    w = jax.random.normal(kw, (Cout, Cin, 2, 2), dtype=jnp.float32) * 0.25

    y = conv2x2(x, w, stride=1, padding=1)
    jax.block_until_ready(y)

    # Reference: XLA's dilated conv with identical semantics.
    ref = jax.lax.conv_general_dilated(
        x, w, window_strides=(1, 1), padding=((1, 1), (1, 1)),
        rhs_dilation=(2, 2), dimension_numbers=("NCHW", "OIHW", "NCHW"))

    assert y.shape == ref.shape == (N, Cout, H, W), (y.shape, ref.shape)
    assert y.dtype == x.dtype
    assert bool(jnp.allclose(y, ref, atol=1e-4, rtol=1e-4))

    print("KERNEL_OK")
</pallas_src>

<mosaic_0001>
module attributes {stable_mosaic.version = 11 : i64} {
  func.func @_conv2x2_mm_kernel(%arg0: i32, %arg1: memref<8x16xf32, #tpu.memory_space<vmem>>, %arg2: memref<16x512xf32, #tpu.memory_space<vmem>>, %arg3: memref<8x512xf32, #tpu.memory_space<vmem>>) attributes {dimension_semantics = [#tpu.dimension_semantics<parallel>], iteration_bounds = array<i64: 1>, scalar_prefetch = 0 : i64, scratch_operands = 0 : i64, tpu.core_type = #tpu.core_type<tc>, window_params = [{pipeline_mode = #tpu.pipeline_mode<synchronous>, transform_indices = @transform_0, window_bounds = array<i64: 8, 16>}, {transform_indices = @transform_1, window_bounds = array<i64: 16, 512>}, {transform_indices = @transform_2, window_bounds = array<i64: 8, 512>}]} {
    %c0 = arith.constant 0 : index
    %c0_0 = arith.constant 0 : index
    %0 = vector.load %arg1[%c0, %c0_0] : memref<8x16xf32, #tpu.memory_space<vmem>>, vector<8x16xf32>
    %c0_1 = arith.constant 0 : index
    %c0_2 = arith.constant 0 : index
    %1 = vector.load %arg2[%c0_1, %c0_2] : memref<16x512xf32, #tpu.memory_space<vmem>>, vector<16x512xf32>
    %cst = arith.constant dense<0.000000e+00> : vector<8x512xf32>
    %2 = tpu.matmul %0, %1, %cst {dimension_numbers = #tpu.dot_dimension_numbers<[1], [0], [0], [1], [0, 0, 1, 1], [], []>} : vector<8x16xf32>, vector<16x512xf32>, vector<8x512xf32> -> vector<8x512xf32>
    %c0_3 = arith.constant 0 : index
    %c0_4 = arith.constant 0 : index
    %3 = vector.load %arg3[%c0_3, %c0_4] : memref<8x512xf32, #tpu.memory_space<vmem>>, vector<8x512xf32>
    tpu.vector_store %arg3[%c0_3, %c0_4], %2 {strides = array<i32>} : memref<8x512xf32, #tpu.memory_space<vmem>>, vector<8x512xf32>,
    return
  }
  func.func @transform_0(%arg0: i32) -> (i32, i32) {
    %c0_i32 = arith.constant 0 : i32
    %c0_i32_0 = arith.constant 0 : i32
    %c0_i32_1 = arith.constant 0 : i32
    return %c0_i32, %c0_i32_0 : i32, i32
  }
  func.func @transform_1(%arg0: i32) -> (i32, i32) {
    %c0_i32 = arith.constant 0 : i32
    %c0_i32_0 = arith.constant 0 : i32
    return %c0_i32, %arg0 : i32, i32
  }
  func.func @transform_2(%arg0: i32) -> (i32, i32) {
    %c0_i32 = arith.constant 0 : i32
    %c0_i32_0 = arith.constant 0 : i32
    return %c0_i32, %arg0 : i32, i32
  }
}

</mosaic_0001>

<bundles_post_ra>
// kernel: tpu_custom_call.1
= control target key start
LH: loop header
LB: loop body
LE: loop exit
PB: predicated region body
PF: predicated region fallthrough
CT: control target
= control target key end

     0   :  { %7 = vsyncpa [#allocation3], 0  ;;  %s365_s0 = inlined_call_operand.hbm [shape: f32[8,16], index: 0, kind: input, shape index: {}]   ;;  %s366_s1 = inlined_call_operand.hbm [shape: f32[16,512], index: 1, kind: input, shape index: {}]   ;;  %s367_s2 = inlined_call_operand.hbm [shape: f32[8,512], index: 2, kind: output, shape index: {}]  }
   0x1   :  { %8 = vsyncpa [#allocation6], 0 }
   0x2   :  { %9 = vsyncpa [#allocation4], 0  ;;  %s301_s9 = smov [#allocation2]   ;;  %s302_s11 = smov [#allocation5]  }
   0x3   :  { %s16_s10 = sshll.u32 %s301_s9, 4  ;;  %s25_s12 = sshll.u32 %s302_s11, 4  ;;  %s17_s10 = int_to_ptr.vmem [resolvable:$true] %s16_s10  ;;  %s322_s12 = int_to_ptr.vmem [resolvable:$true] %s25_s12 }
   0x4   :  { %s229_s15 = scalar_lea.hbm %s365_s0, 128 }
   0x5   :  { %p230_p0 = scmp.ne.s32.totalorder %s365_s0, %s229_s15  ;;  %p233_p1 = scmp.lt.u32.totalorder %s229_s15, %s365_s0 }
   0x7   :  { %p235_p2 = pnand %p233_p1, %p230_p0 }
   0x9   :  { %238 = shalt.err (!%p235_p2)
}
   0xa   :  { %s239_s20 = scalar_lea.vmem %s17_s10, 128  ;;  %p244_p4 = scmp.lt.s32.totalorder %s17_s10, %s17_s10 }
   0xb   :  { %p240_p3 = scmp.ne.s32.totalorder %s17_s10, %s239_s20  ;;  %p245_p5 = scmp.lt.s32.totalorder %s239_s20, %s239_s20 }
   0xd   :  { %p246_p6 = por %p245_p5, %p244_p4 }
   0xf   :  { %p247_p7 = pnand %p246_p6, %p240_p3 }
  0x11   :  { %250 = shalt.err (!%p247_p7)
}
  0x12   :  { %19 = dma.hbm_to_vmem [thread:$0]  %s365_s0, 128, %s17_s10, [#allocation3]  }
  0x13   :  { %s251_s25 = scalar_lea.hbm %s366_s1, 1024 }
  0x14   :  { %p252_p8 = scmp.ne.s32.totalorder %s366_s1, %s251_s25  ;;  %p255_p9 = scmp.lt.u32.totalorder %s251_s25, %s366_s1 }
  0x16   :  { %p257_p10 = pnand %p255_p9, %p252_p8 }
  0x18   :  { %260 = shalt.err (!%p257_p10)
}
  0x19   :  { %s261_s30 = scalar_lea.vmem %s322_s12, 1024  ;;  %p266_p12 = scmp.lt.s32.totalorder %s322_s12, %s322_s12 }
  0x1a   :  { %p262_p11 = scmp.ne.s32.totalorder %s322_s12, %s261_s30  ;;  %p267_p13 = scmp.lt.s32.totalorder %s261_s30, %s261_s30 }
  0x1c   :  { %p268_p0 = por %p267_p13, %p266_p12 }
  0x1e   :  { %p269_p1 = pnand %p268_p0, %p262_p11 }
  0x20   :  { %272 = shalt.err (!%p269_p1)
}
  0x21   :  { %s303_s0 = smov 512   ;;  %s304_s3 = smov 32  }
  0x22   :  { %31 = dma.hbm_to_vmem [thread:$0]  %s366_s1, 1024, %s322_s12, [#allocation6], %s303_s0, %s303_s0, %s304_s3  }
  0x23   :  { %295 = dma.done.wait [#allocation3], 128  }
  0x24   :  { %296 = vsyncadd [#allocation3], 4294967168 }
  0x25   :  { %297 = dma.done.wait [#allocation6], 1024  }
  0x26   :  { %298 = vsyncadd [#allocation6], 4294966272  ;;  %v305_v0 = vmov 0.0   ;;  %v40_v1 = vld [vmem:[#allocation5 + $0x8] sm:$0xff]  ;;  %v42_v3 = vld [vmem:[#allocation5 + $0x18] sm:$0xff]  ;;  %vm47_vm0 = vcmask 130048  }
  0x27   :  { %115 = vmatprep.mubr.f32.mxu0 %v305_v0  ;;  %186 = vmatprep.mubr.f32.mxu1 %v305_v0  ;;  %v44_v2 = vld [vmem:[#allocation5 + $0x28] sm:$0xff]  ;;  %v46_v5 = vld [vmem:[#allocation5 + $0x38] sm:$0xff]  ;;  %v39_v6 = vld [vmem:[#allocation5] sm:$0xff]  ;;  %s306_s1 = smov [#allocation7]  }
  0x28   :  { %v215_v4 = vpack.c.bf16 %v44_v2, %v40_v1  ;;  %v43_v7 = vld [vmem:[#allocation5 + $0x20] sm:$0xff]  ;;  %v219_v8 = vpack.c.bf16 %v46_v5, %v42_v3  ;;  %v41_v10 = vld [vmem:[#allocation5 + $0x10] sm:$0xff]  ;;  %v38_v13 = vld [vmem:[#allocation2] sm:$0xff]  ;;  %s203_s6 = sshll.u32 %s306_s1, 4  ;;  %s204_s6 = int_to_ptr.vmem [resolvable:$true] %s203_s6 }
  0x29   :  { %v217_v9 = vpack.c.bf16 %v43_v7, %v39_v6  ;;  %v45_v11 = vld [vmem:[#allocation5 + $0x30] sm:$0xff]  ;;  %s273_s7 = scalar_lea.vmem %s204_s6, 512  ;;  %p278_p3 = scmp.lt.s32.totalorder %s204_s6, %s204_s6 }
  0x2a   :  { %216 = vmatprep.subr.bf16.mxu0 %v215_v4  ;;  %v221_v12 = vpack.c.bf16 %v45_v11, %v41_v10  ;;  %220 = vmatprep.subr.bf16.mxu1 %v219_v8  ;;  %p274_p2 = scmp.ne.s32.totalorder %s204_s6, %s273_s7  ;;  %p279_p4 = scmp.lt.s32.totalorder %s273_s7, %s273_s7 }
  0x2b   :  { %218 = vmatpush1.bf16.msra.mxu0 %v217_v9 }
  0x2c   :  { %222 = vmatpush1.bf16.msra.mxu1 %v221_v12  ;;  %p280_p5 = por %p279_p4, %p278_p3 }
  0x2e   :  { %213 = vmatmul.mubr.msk.f32.vlgmr.msra.gmra.mrb[0].mxu0 %vm47_vm0, %v38_v13  ;;  %p281_p6 = pnand %p280_p5, %p274_p2 }
  0x2f   :  { %214 = vmatmul.mubr.msk.f32.vlgmr.msra.gmra.mrb[0].mxu1 %vm47_vm0, %v38_v13 }
 0x101   :  { %v117_v14 = vpop.f32.mrb[0].mxu0 }
 0x102   :  { %193 = vst [vmem:[#allocation7] sm:$0xff] %v117_v14  ;;  %v188_v15 = vpop.f32.mrb[0].mxu1  ;;  %v119_v16 = vpop.f32.mrb[1].mxu0 }
 0x103   :  { %195 = vst [vmem:[#allocation7 + $0x10] sm:$0xff] %v188_v15  ;;  %194 = vst [vmem:[#allocation7 + $0x8] sm:$0xff] %v119_v16  ;;  %v190_v17 = vpop.f32.mrb[1].mxu1 }
 0x104   :  { %196 = vst [vmem:[#allocation7 + $0x18] sm:$0xff] %v190_v17 }
 0x105   :  { %284 = shalt.err (!%p281_p6)
}
 0x106   :  { %s285_s10 = scalar_lea.hbm %s367_s2, 512 }
 0x107   :  { %p286_p7 = scmp.ne.s32.totalorder %s367_s2, %s285_s10  ;;  %p289_p8 = scmp.lt.u32.totalorder %s285_s10, %s367_s2 }
 0x109   :  { %p291_p9 = pnand %p289_p8, %p286_p7 }
 0x10b   :  { %294 = shalt.err (!%p291_p9)
}
 0x10c   :  { %206 = dma.vmem_to_hbm [thread:$0]  %s204_s6, 512, %s367_s2, [#allocation4]  }
 0x10d   :  { %299 = dma.done.wait [#allocation4], 512  }
 0x10e   :  { %300 = vsyncadd [#allocation4], 4294966784 }
 0x10f   :  { %210 = vsyncpa [#allocation3], 1 }
 0x110   :  { %211 = vsyncpa [#allocation6], 1 }
 0x111   :  { %212 = vsyncpa [#allocation4], 1 }

</bundles_post_ra>
